<compile_context>
chip_gen: v6e
topology: v6e:2x2x1
jax: 0.10.0
libtpu: 0.0.40
codegen_flags: <defaults>
</compile_context>

<pallas_src>
import functools

import jax
import jax.numpy as jnp
from jax.experimental import pallas as pl
from jax.experimental.pallas import tpu as pltpu


def _round_up(x, m):
    return ((x + m - 1) // m) * m


def _cdiv(a, b):
    return (a + b - 1) // b


def _vmem_capacity_bytes():
    try:
        info = pltpu.get_tpu_info()
        cap = getattr(info, "vmem_capacity_bytes", None)
        if cap:
            return int(cap)
    except Exception:
        pass
    return 64 * 1024 * 1024  # conservative default (v7x per-TC VMEM)


# -----------------------------------------------------------------------------
# Shared epilogue: softmax over classes + TTA merge into the resident out block
# -----------------------------------------------------------------------------
def _softmax_merge(logits, o_ref, a, merge_mode, eps, n_aug):
    m = jnp.max(logits, axis=-1, keepdims=True)
    e = jnp.exp(logits - m)
    s = jnp.sum(e, axis=-1, keepdims=True)
    inv_n = 1.0 / n_aug

    if merge_mode == "mean":
        # fold 1/A into the softmax normalization
        contrib = e * (pl.reciprocal(s, approx=True) * inv_n)

        @pl.when(a == 0)
        def _():
            o_ref[...] = contrib

        @pl.when(a > 0)
        def _():
            o_ref[...] += contrib

    elif merge_mode == "gmean":
        # exact division: approx reciprocal error is amplified by log->mean->exp
        probs = e / s
        contrib = jnp.log(jnp.maximum(probs, eps)) * inv_n

        @pl.when(a == 0)
        def _():
            o_ref[...] = contrib

        @pl.when(a > 0)
        def _():
            o_ref[...] += contrib

        @pl.when(a == n_aug - 1)
        def _():
            o_ref[...] = jnp.exp(o_ref[...])

    elif merge_mode == "max":
        probs = e * pl.reciprocal(s, approx=True)

        @pl.when(a == 0)
        def _():
            o_ref[...] = probs

        @pl.when(a > 0)
        def _():
            o_ref[...] = jnp.maximum(o_ref[...], probs)

    else:
        raise ValueError(f"unknown merge_mode {merge_mode!r}")


# -----------------------------------------------------------------------------
# Kernels
# -----------------------------------------------------------------------------
def _tta_kernel_fullk(x_ref, w_ref, b_ref, o_ref, *, merge_mode, eps, n_aug):
    """grid = (B tiles [parallel], A augmentations [arbitrary]); W resident."""
    a = pl.program_id(1)
    logits = jnp.dot(x_ref[...], w_ref[...],
                     preferred_element_type=jnp.float32) + b_ref[...]
    _softmax_merge(logits, o_ref, a, merge_mode, eps, n_aug)


def _tta_kernel_ktiled(x_ref, w_ref, b_ref, o_ref, logits_acc,
                       *, merge_mode, eps, n_aug, tk, w_is_full):
    """grid = (B tiles [parallel], A [arbitrary], K [arbitrary])."""
    a = pl.program_id(1)
    k = pl.program_id(2)
    nk = pl.num_programs(2)

    @pl.when(k == 0)
    def _():
        # fold the bias into the accumulator init (padded classes get -1e30)
        logits_acc[...] = jnp.broadcast_to(b_ref[...], logits_acc.shape)

    if w_is_full:
        i = pl.multiple_of(k * tk, tk)
        w_blk = w_ref[pl.ds(i, tk), :]
    else:
        w_blk = w_ref[...]

    # bf16 x bf16 -> f32 accumulate on the MXU
    logits_acc[...] += jnp.dot(x_ref[...], w_blk,
                               preferred_element_type=jnp.float32)

    @pl.when(k == nk - 1)
    def _():
        _softmax_merge(logits_acc[...], o_ref, a, merge_mode, eps, n_aug)


# -----------------------------------------------------------------------------
# Tile planning
# -----------------------------------------------------------------------------
def _plan_tiles(A, B, F, NC, *, b_tile_max=512, k_tile_max=2048,
                w_resident_max=16 << 20, force_k_tiling=False):
    NC_pad = _round_up(NC, 128)
    F_pad = _round_up(F, 128)

    # Batch tiling: derive nb from b_tile_max first (avoids round-up-to-tile
    # padding waste), then aim for nb >= 2 so the 'parallel' axis feeds both
    # v7x TensorCores when B is large enough to split.
    nb = max(1, _cdiv(B, b_tile_max))
    if nb == 1 and B >= 32:
        nb = 2
    B_tile = _round_up(_cdiv(B, nb), 16)
    nb = _cdiv(B, B_tile)
    B_pad = nb * B_tile

    vmem_cap = _vmem_capacity_bytes()
    budget = min(int(vmem_cap * 0.75), 96 << 20)

    w_bytes = F_pad * NC_pad * 2  # bf16

    def usage_single(bt):
        return (2 * bt * F_pad * 2        # X double buffer (bf16)
                + 2 * w_bytes             # W (counted x2 to be safe)
                + 2 * bt * NC_pad * 4     # output double buffer (f32)
                + 2 * NC_pad * 4)         # bias

    w_resident = w_bytes <= min(w_resident_max, budget // 3)
    use_k = force_k_tiling or (not w_resident) or (usage_single(B_tile) > budget)

    if not use_k:
        usage = usage_single(B_tile)
        vmem_limit = int(min(0.9 * vmem_cap, max(32 << 20, 2 * usage)))
        return dict(NC_pad=NC_pad, F_pad=F_pad, B_tile=B_tile, B_pad=B_pad,
                    tk=F_pad, use_k=False, w_resident=True,
                    vmem_limit=vmem_limit)

    # K-tiled fallback: shrink tk (then B_tile) until the footprint fits.
    tk = min(_round_up(max(128, min(k_tile_max, F_pad)), 128), F_pad)
    while True:
        w_cost = 2 * w_bytes if w_resident else 2 * tk * NC_pad * 2
        usage = (2 * B_tile * tk * 2      # X double buffer
                 + w_cost
                 + 2 * B_tile * NC_pad * 4   # output double buffer
                 + B_tile * NC_pad * 4       # logits accumulator scratch
                 + 2 * NC_pad * 4)
        if usage <= budget:
            break
        if w_resident and 2 * w_bytes > budget // 2:
            w_resident = False
            continue
        if tk > 128:
            tk = max(128, _round_up(tk // 2, 128))
        elif B_tile > 16:
            B_tile = max(16, _round_up(B_tile // 2, 16))
        else:
            break

    nb = _cdiv(B, B_tile)
    B_pad = nb * B_tile
    F_pad = _round_up(F_pad, tk)
    vmem_limit = int(min(0.9 * vmem_cap, max(32 << 20, 2 * usage)))
    return dict(NC_pad=NC_pad, F_pad=F_pad, B_tile=B_tile, B_pad=B_pad,
                tk=tk, use_k=True, w_resident=w_resident,
                vmem_limit=vmem_limit)


# -----------------------------------------------------------------------------
# pallas_call wrapper
# -----------------------------------------------------------------------------
def _tta_pallas(x_p, w, b, plan, merge_mode, eps):
    """x_p: (A, B_pad, F_pad) bf16 padded augmented stack."""
    A, B_pad, F_pad = x_p.shape
    F, NC = w.shape
    NC_pad = plan["NC_pad"]
    B_tile = plan["B_tile"]
    tk = plan["tk"]
    nb = B_pad // B_tile
    nk = F_pad // tk

    w_p = jnp.zeros((F_pad, NC_pad), jnp.bfloat16)
    w_p = w_p.at[:F, :NC].set(w.astype(jnp.bfloat16))
    # Padded classes get a hugely negative bias -> softmax prob ~ 0 there.
    b_p = jnp.full((1, NC_pad), -1e30, jnp.float32)
    b_p = b_p.at[0, :NC].set(b.astype(jnp.float32))

    if not plan["use_k"]:
        kernel = functools.partial(_tta_kernel_fullk, merge_mode=merge_mode,
                                   eps=eps, n_aug=A)
        out = pl.pallas_call(
            kernel,
            out_shape=jax.ShapeDtypeStruct((B_pad, NC_pad), jnp.float32),
            grid_spec=pltpu.PrefetchScalarGridSpec(
                num_scalar_prefetch=0,
                grid=(nb, A),
                in_specs=[
                    # one contiguous (B_tile, F_pad) slab of one augmentation
                    pl.BlockSpec((None, B_tile, F_pad), lambda bi, a: (a, bi, 0)),
                    # W resident in VMEM (constant block index -> no re-DMA)
                    pl.BlockSpec((F_pad, NC_pad), lambda bi, a: (0, 0)),
                    pl.BlockSpec((1, NC_pad), lambda bi, a: (0, 0)),
                ],
                # output block index constant in a -> resident merge accumulator
                out_specs=pl.BlockSpec((B_tile, NC_pad), lambda bi, a: (bi, 0)),
            ),
            compiler_params=pltpu.CompilerParams(
                dimension_semantics=("parallel", "arbitrary"),
                vmem_limit_bytes=plan["vmem_limit"],
            ),
        )(x_p, w_p, b_p)
        return out

    # ---- K-tiled fallback (large feature dims) ----
    w_is_full = plan["w_resident"]
    kernel = functools.partial(_tta_kernel_ktiled, merge_mode=merge_mode,
                               eps=eps, n_aug=A, tk=tk, w_is_full=w_is_full)
    if w_is_full:
        w_spec = pl.BlockSpec((F_pad, NC_pad), lambda bi, a, k: (0, 0))
    else:
        w_spec = pl.BlockSpec((tk, NC_pad), lambda bi, a, k: (k, 0))

    # TODO(synk): optionally sweep pipeline_mode=pl.Buffered(3) on the X spec.
    out = pl.pallas_call(
        kernel,
        out_shape=jax.ShapeDtypeStruct((B_pad, NC_pad), jnp.float32),
        grid_spec=pltpu.PrefetchScalarGridSpec(
            num_scalar_prefetch=0,
            grid=(nb, A, nk),
            in_specs=[
                pl.BlockSpec((None, B_tile, tk), lambda bi, a, k: (a, bi, k)),
                w_spec,
                pl.BlockSpec((1, NC_pad), lambda bi, a, k: (0, 0)),
            ],
            out_specs=pl.BlockSpec((B_tile, NC_pad), lambda bi, a, k: (bi, 0)),
            scratch_shapes=[pltpu.VMEM((B_tile, NC_pad), jnp.float32)],
        ),
        compiler_params=pltpu.CompilerParams(
            dimension_semantics=("parallel", "arbitrary", "arbitrary"),
            vmem_limit_bytes=plan["vmem_limit"],
        ),
    )(x_p, w_p, b_p)
    return out


# -----------------------------------------------------------------------------
# Glue: TTA transformations + flattening (mirrors the PyTorch forward structure)
# -----------------------------------------------------------------------------
def build_augmented_stack(x, transformations, B_pad, F_pad,
                          dtype=jnp.bfloat16):
    """x: (B, C, T). Each transformation acts on a per-sample (T, C) array.

    Produces the augmented stack already cast to bf16 and zero-padded to
    (A, B_pad, F_pad) in one fused pass (no separate pad/cast HBM pass).
    """
    # TODO(synk): the PyTorch module calls arbitrary host-side numpy
    # T.transform(...) per sample; here we use deterministic JAX equivalents.
    B, C, T = x.shape
    Tx = [x]
    xt = jnp.transpose(x, (0, 2, 1))                 # == torch.transpose(x, 2, 1)
    for T_fn in transformations:
        transformed = jax.vmap(T_fn)(xt)             # apply along batch axis
        Tx.append(jnp.transpose(transformed, (0, 2, 1)))
    A = len(Tx)
    F = C * T
    flat = jnp.stack([t.reshape(B, -1) for t in Tx], axis=0).astype(dtype)
    if B_pad == B and F_pad == F:
        return flat
    out = jnp.zeros((A, B_pad, F_pad), dtype)
    return out.at[:, :B, :F].set(flat)


def _time_flip(y):      # reverse time axis of a (T, C) sample
    return y[::-1, :]


def _negate(y):         # sign flip
    return -y


def tta_classifier_apply(x, w, b, transformations, merge_mode="mean",
                         eps=1e-9, **plan_kwargs):
    """End-to-end TTAClassifier forward.  Returns (probs, None, None)."""
    B, C, T = x.shape
    F = C * T
    A = 1 + len(transformations)
    NC = w.shape[1]
    plan = _plan_tiles(A, B, F, NC, **plan_kwargs)
    x_p = build_augmented_stack(x, transformations, plan["B_pad"], plan["F_pad"])
    out = _tta_pallas(x_p, w, b, plan, merge_mode, eps)
    return out[:B, :NC], None, None


# -----------------------------------------------------------------------------
# Pure-JAX reference (uses the same bf16-rounded inputs the kernel streams)
# -----------------------------------------------------------------------------
def reference_forward(x, w, b, transformations, merge_mode="mean", eps=1e-9):
    B, C, T = x.shape
    Tx = [x]
    xt = jnp.transpose(x, (0, 2, 1))
    for T_fn in transformations:
        Tx.append(jnp.transpose(jax.vmap(T_fn)(xt), (0, 2, 1)))
    x_all = jnp.stack([t.reshape(B, -1) for t in Tx], axis=0)
    xb = x_all.astype(jnp.bfloat16).astype(jnp.float32)
    wb = w.astype(jnp.bfloat16).astype(jnp.float32)
    logits = jnp.einsum("abf,fn->abn", xb, wb) + b[None, None, :].astype(jnp.float32)
    probs = jax.nn.softmax(logits, axis=-1)
    if merge_mode == "mean":
        return probs.mean(axis=0)
    if merge_mode == "gmean":
        return jnp.exp(jnp.log(jnp.clip(probs, eps)).mean(axis=0))
    return probs.max(axis=0)


if __name__ == "__main__":
    key = jax.random.PRNGKey(0)
    kx, kw, kb = jax.random.split(key, 3)

    # small shapes: batch=2, channels=4, seq=16 -> features=64, num_classes=8
    B, C, T, NC = 2, 4, 16, 8
    F = C * T

    x = jax.random.normal(kx, (B, C, T), dtype=jnp.float32)
    # deterministic synthetic classifier parameters (linear head on flat input)
    w = jax.random.normal(kw, (F, NC), dtype=jnp.float32) * 0.1
    b = jax.random.normal(kb, (NC,), dtype=jnp.float32) * 0.01

    transformations = [_time_flip, _negate]

    # --- main path: full-K, resident-W kernel -------------------------------
    for merge_mode in ("mean", "gmean", "max"):
        out, _, _ = tta_classifier_apply(x, w, b, transformations,
                                         merge_mode=merge_mode)
        out = jax.block_until_ready(out)
        ref = reference_forward(x, w, b, transformations, merge_mode=merge_mode)
        assert out.shape == (B, NC)
        assert jnp.allclose(out, ref, atol=5e-3, rtol=0.0), (
            f"mismatch vs reference for merge_mode={merge_mode}: "
            f"max abs diff {float(jnp.max(jnp.abs(out - ref)))}")

    # --- K-tiled fallback paths (larger feature dim), mean merge ------------
    B2, C2, T2 = 4, 4, 96            # F=384 -> nk=3 with tk=128
    F2 = C2 * T2
    x2 = jax.random.normal(jax.random.PRNGKey(1), (B2, C2, T2), jnp.float32)
    w2 = jax.random.normal(jax.random.PRNGKey(2), (F2, NC), jnp.float32) * 0.1
    b2 = jax.random.normal(jax.random.PRNGKey(3), (NC,), jnp.float32) * 0.01
    for plan_kwargs in (
        {"force_k_tiling": True, "k_tile_max": 128},                      # resident W, in-kernel pl.ds slice
        {"force_k_tiling": True, "k_tile_max": 128, "w_resident_max": 0}, # streamed W per k
    ):
        out2, _, _ = tta_classifier_apply(x2, w2, b2, transformations,
                                          merge_mode="mean", **plan_kwargs)
        out2 = jax.block_until_ready(out2)
        ref2 = reference_forward(x2, w2, b2, transformations, merge_mode="mean")
        assert out2.shape == (B2, NC)
        assert jnp.allclose(out2, ref2, atol=5e-3, rtol=0.0), (
            f"k-tiled mismatch ({plan_kwargs}): "
            f"max abs diff {float(jnp.max(jnp.abs(out2 - ref2)))}")

    print("KERNEL_OK")
</pallas_src>

<mosaic_0001>
module attributes {stable_mosaic.version = 11 : i64} {
  func.func @_tta_kernel_fullk(%arg0: i32, %arg1: i32, %arg2: memref<1x16x128xbf16, #tpu.memory_space<vmem>>, %arg3: memref<128x128xbf16, #tpu.memory_space<vmem>>, %arg4: memref<1x128xf32, #tpu.memory_space<vmem>>, %arg5: memref<16x128xf32, #tpu.memory_space<vmem>>) attributes {dimension_semantics = [#tpu.dimension_semantics<parallel>, #tpu.dimension_semantics<arbitrary>], iteration_bounds = array<i64: 1, 3>, scalar_prefetch = 0 : i64, scratch_operands = 0 : i64, tpu.core_type = #tpu.core_type<tc>, window_params = [{transform_indices = @transform_0, window_bounds = array<i64: 1, 16, 128>}, {pipeline_mode = #tpu.pipeline_mode<synchronous>, transform_indices = @transform_1, window_bounds = array<i64: 128, 128>}, {pipeline_mode = #tpu.pipeline_mode<synchronous>, transform_indices = @transform_2, window_bounds = array<i64: 1, 128>}, {transform_indices = @transform_3, window_bounds = array<i64: 16, 128>}]} {
    %c0 = arith.constant 0 : index
    %c0_0 = arith.constant 0 : index
    %c0_1 = arith.constant 0 : index
    %0 = vector.load %arg2[%c0, %c0_0, %c0_1] : memref<1x16x128xbf16, #tpu.memory_space<vmem>>, vector<1x16x128xbf16>
    %1 = vector.shape_cast %0 : vector<1x16x128xbf16> to vector<16x128xbf16>
    %c0_2 = arith.constant 0 : index
    %c0_3 = arith.constant 0 : index
    %2 = vector.load %arg3[%c0_2, %c0_3] : memref<128x128xbf16, #tpu.memory_space<vmem>>, vector<128x128xbf16>
    %cst = arith.constant dense<0.000000e+00> : vector<16x128xf32>
    %3 = tpu.matmul %1, %2, %cst {dimension_numbers = #tpu.dot_dimension_numbers<[1], [0], [0], [1], [0, 0, 1, 1], [], []>} : vector<16x128xbf16>, vector<128x128xbf16>, vector<16x128xf32> -> vector<16x128xf32>
    %c0_4 = arith.constant 0 : index
    %c0_5 = arith.constant 0 : index
    %4 = vector.load %arg4[%c0_4, %c0_5] : memref<1x128xf32, #tpu.memory_space<vmem>>, vector<1x128xf32>
    %5 = vector.broadcast %4 : vector<1x128xf32> to vector<16x128xf32>
    %6 = arith.addf %3, %5 : vector<16x128xf32>
    %cst_6 = arith.constant dense<0xFF800000> : vector<16xf32>
    %7 = vector.multi_reduction <maximumf>, %6, %cst_6 [1] : vector<16x128xf32> to vector<16xf32>
    %8 = vector.shape_cast %7 : vector<16xf32> to vector<16x1xf32>
    %9 = vector.broadcast %8 : vector<16x1xf32> to vector<16x128xf32>
    %10 = arith.subf %6, %9 : vector<16x128xf32>
    %11 = math.exp %10 : vector<16x128xf32>
    %cst_7 = arith.constant dense<0.000000e+00> : vector<16xf32>
    %12 = vector.multi_reduction <add>, %11, %cst_7 [1] : vector<16x128xf32> to vector<16xf32>
    %13 = vector.shape_cast %12 : vector<16xf32> to vector<16x1xf32>
    %14 = tpu.reciprocal %13 {approx = true} : vector<16x1xf32> -> vector<16x1xf32>
    %cst_8 = arith.constant 0.333333343 : f32
    %15 = vector.broadcast %cst_8 : f32 to vector<16x1xf32>
    %16 = arith.mulf %14, %15 : vector<16x1xf32>
    %17 = vector.broadcast %16 : vector<16x1xf32> to vector<16x128xf32>
    %18 = arith.mulf %11, %17 : vector<16x128xf32>
    %c0_i32 = arith.constant 0 : i32
    %19 = arith.cmpi eq, %arg1, %c0_i32 : i32
    %20 = arith.extui %19 : i1 to i32
    %c0_i32_9 = arith.constant 0 : i32
    %21 = arith.cmpi ne, %20, %c0_i32_9 : i32
    scf.if %21 {
      %c0_12 = arith.constant 0 : index
      %c0_13 = arith.constant 0 : index
      %25 = vector.load %arg5[%c0_12, %c0_13] : memref<16x128xf32, #tpu.memory_space<vmem>>, vector<16x128xf32>
      tpu.vector_store %arg5[%c0_12, %c0_13], %18 {strides = array<i32>} : memref<16x128xf32, #tpu.memory_space<vmem>>, vector<16x128xf32>,
    } else {
    }
    %c0_i32_10 = arith.constant 0 : i32
    %22 = arith.cmpi sgt, %arg1, %c0_i32_10 : i32
    %23 = arith.extui %22 : i1 to i32
    %c0_i32_11 = arith.constant 0 : i32
    %24 = arith.cmpi ne, %23, %c0_i32_11 : i32
    scf.if %24 {
      %c0_12 = arith.constant 0 : index
      %c0_13 = arith.constant 0 : index
      %25 = vector.load %arg5[%c0_12, %c0_13] : memref<16x128xf32, #tpu.memory_space<vmem>>, vector<16x128xf32>
      %26 = arith.addf %25, %18 : vector<16x128xf32>
      %c0_14 = arith.constant 0 : index
      %c0_15 = arith.constant 0 : index
      %27 = vector.load %arg5[%c0_14, %c0_15] : memref<16x128xf32, #tpu.memory_space<vmem>>, vector<16x128xf32>
      tpu.vector_store %arg5[%c0_14, %c0_15], %26 {strides = array<i32>} : memref<16x128xf32, #tpu.memory_space<vmem>>, vector<16x128xf32>,
    } else {
    }
    return
  }
  func.func @transform_0(%arg0: i32, %arg1: i32) -> (i32, i32, i32) {
    %c0_i32 = arith.constant 0 : i32
    %c0_i32_0 = arith.constant 0 : i32
    return %arg1, %arg0, %c0_i32 : i32, i32, i32
  }
  func.func @transform_1(%arg0: i32, %arg1: i32) -> (i32, i32) {
    %c0_i32 = arith.constant 0 : i32
    %c0_i32_0 = arith.constant 0 : i32
    %c0_i32_1 = arith.constant 0 : i32
    return %c0_i32, %c0_i32_0 : i32, i32
  }
  func.func @transform_2(%arg0: i32, %arg1: i32) -> (i32, i32) {
    %c0_i32 = arith.constant 0 : i32
    %c0_i32_0 = arith.constant 0 : i32
    %c0_i32_1 = arith.constant 0 : i32
    return %c0_i32, %c0_i32_0 : i32, i32
  }
  func.func @transform_3(%arg0: i32, %arg1: i32) -> (i32, i32) {
    %c0_i32 = arith.constant 0 : i32
    %c0_i32_0 = arith.constant 0 : i32
    return %arg0, %c0_i32 : i32, i32
  }
}

</mosaic_0001>

<bundles_post_ra>
// kernel: tpu_custom_call.1
= control target key start
LH: loop header
LB: loop body
LE: loop exit
PB: predicated region body
PF: predicated region fallthrough
CT: control target
= control target key end

     0   :  { %8 = vsyncpa [#allocation3], 0  ;;  %s928_s0 = inlined_call_operand.hbm [shape: bf16[3,16,128], index: 0, kind: input, shape index: {}]   ;;  %s929_s1 = inlined_call_operand.hbm [shape: bf16[128,128], index: 1, kind: input, shape index: {}]   ;;  %s930_s2 = inlined_call_operand.vmem [shape: f32[1,128], index: 2, kind: input, shape index: {}]   ;;  %s931_s3 = inlined_call_operand.hbm [shape: f32[16,128], index: 3, kind: output, shape index: {}]  }
   0x1   :  { %10 = vsyncpa [#allocation3 + $0x1], 0 }
   0x2   :  { %11 = vsyncpa [#allocation6], 0 }
   0x3   :  { %12 = vsyncpa [#allocation4], 0  ;;  %s777_s12 = smov 0   ;;  %s779_s13 = smov 0  }
   0x4   :  { %s781_s14 = smov 0   ;;  %s783_s15 = smov 0  }
   0x5   :  { %s785_s16 = smov 0   ;;  %s787_s17 = smov 0  }
   0x6 LB: > { %s458_s18 = sadd.s32 4294967295, %s746_s17   ;;  %p52_p0 = scmp.ne.s32.totalorder %s730_s13, %s726_s12  ;;  %s746_s17 = sphi %s787_s17, %s18_s17   ;;  %s742_s16 = sphi %s785_s16, %s942_s16   ;;  %s738_s15 = sphi %s783_s15, %s941_s15   ;;  %s734_s14 = sphi %s781_s14, %s940_s14   ;;  %s730_s13 = sphi %s779_s13, %s939_s13   ;;  %s726_s12 = sphi %s777_s12, %s938_s12  }
   0x7   : > { %p809_p1 = scmp.eq.s32.totalorder %s458_s18, 0  ;;  %p459_p2 = scmp.ge.s32.totalorder %s746_s17, 1 }
   0x8   : > { %p131_p3 = scmp.lt.s32.totalorder %s746_s17, 4  ;;  %s748_s22 = smov [#allocation5]  }
   0x9   : > { %p817_p4 = por %p809_p1, %p52_p0  ;;  %s143_s23 = sshll.u32 %s748_s22, 4  ;;  %s144_s23 = int_to_ptr.vmem [resolvable:$true] %s143_s23 }
   0xa   : > { %p821_p5 = pnand %p459_p2, %p131_p3  ;;  %s27_s25 = sadd.s32 1, %s742_s16 }
   0xb   : > { %s621_s26 = scalar_lea.vmem %s144_s23, 1024  ;;  %p629_p12 = scmp.lt.s32.totalorder %s144_s23, %s144_s23 }
   0xc   : > { %p524_p6 = pneg %p821_p5  ;;  %p622_p9 = scmp.ne.s32.totalorder %s144_s23, %s621_s26 }
   0xd   : > { %p630_p13 = scmp.lt.s32.totalorder %s621_s26, %s621_s26 }
   0xe   : > { %p829_p7 = pnand %p524_p6, %p809_p1 }
   0xf   : > { %p631_p0 = por %p630_p13, %p629_p12 }
  0x10   : > { %p612_p8 = pneg %p829_p7 }
  0x12   : > { %p624_p10 = pnand %p622_p9, %p612_p8 }
  0x14   : > { %p625_p11 = pneg %p624_p10 }
  0x16   : > { %p632_p2 = pnand %p631_p0, %p625_p11 }
  0x18   : > { %635 = shalt.err (!%p632_p2)
}
  0x19   : > { %s749_s27 = smov 64   ;;  %s750_s28 = smov 4  }
  0x1a   : > { %527 = dma.hbm_to_vmem [thread:$0]  (!%p829_p7), %s929_s1, 1024, %s144_s23, [#allocation6], %s749_s27, %s749_s27, %s750_s28  }
  0x1b   : > { %p28_p3 = scmp.ge.s32.totalorder %s27_s25, 3  ;;  %s39_s4 = sadd.s32 1, %s734_s14 }
  0x1c   : > { %p46_p6 = scmp.ne.s32.totalorder %s734_s14, %s730_s13  ;;  %p47_p8 = scmp.eq.s32.totalorder %s746_s17, 0 }
  0x1d   : > { %s944_s25 = smov (%p28_p3, %s27_s25), 0  ;;  %p533_p10 = scmp.lt.s32.totalorder %s746_s17, 3 }
  0x1e   : > { %p48_p9 = por %p47_p8, %p46_p6  ;;  %s34_s5 = ssub.s32 %s742_s16, %s944_s25 }
  0x1f   : > { %s160_s6 = sand.u32 1, %s734_s14   ;;  %p37_p11 = scmp.eq.s32.totalorder %s34_s5, 0 }
  0x20   : > { %s462_s7 = sshll.u32 %s160_s6, 3  ;;  %s484_s8 = sshll.u32 %s742_s16, 7 }
  0x21   : > { %s856_s9 = scalar_select %p37_p11, %s734_s14, %s39_s4  }
  0x22   : > { %s172_s12 = scalar_lea.hbm %s928_s0, %s484_s8  ;;  %s164_s22 = scalar_lea.vmem [#allocation2], %s462_s7 }
  0x23   : > { %s173_s23 = sshll.u32 %s164_s22, 4  ;;  %p861_p7 = pnand %p533_p10, %p48_p9  ;;  %s174_s23 = int_to_ptr.vmem [resolvable:$true] %s173_s23 }
  0x24   : > { %s161_s26 = scalar_lea.sflag [#allocation3], %s160_s6  ;;  %s649_s29 = scalar_lea.vmem %s174_s23, 128 }
  0x25   : > { %p638_p12 = pneg %p861_p7  ;;  %p650_p13 = scmp.ne.s32.totalorder %s174_s23, %s649_s29 }
  0x26   : > { %s751_s30 = smov [#allocation2]  }
  0x27   : > { %p652_p0 = pnand %p650_p13, %p638_p12  ;;  %s654_s4 = sshll.u32 %s751_s30, 4  ;;  %s655_s4 = int_to_ptr.vmem [resolvable:$false] %s654_s4 }
  0x28   : > { %s656_s5 = scalar_lea.vmem %s655_s4, 256  ;;  %p657_p3 = scmp.lt.s32.totalorder %s174_s23, %s655_s4 }
  0x29   : > { %p653_p2 = pneg %p652_p0  ;;  %p658_p6 = scmp.lt.s32.totalorder %s656_s5, %s649_s29 }
  0x2b   : > { %p659_p8 = por %p658_p6, %p657_p3 }
  0x2d   : > { %p660_p9 = pnand %p659_p8, %p653_p2 }
  0x2f   : > { %663 = shalt.err (!%p660_p9)
}
  0x30   : > { %531 = dma.hbm_to_vmem [thread:$0]  (!%p861_p7), %s172_s12, 128, %s174_s23, %s161_s26, %s749_s27, %s749_s27, %s750_s28  }
  0x31   : > { %185 = sbr.rel (%p821_p5) target bundleno = 629 (0x275), region = 32  ;;  %s187_s6 = sand.u32 (!%p821_p5), 1, %s730_s13  }
  0x32   : > { %s875_s7 = sshll.u32 (!%p821_p5), %s187_s6, 3  ;;  %s188_s8 = scalar_lea.sflag (!%p821_p5), [#allocation3], %s187_s6 }
  0x33   : > { %s191_s10 = scalar_lea.vmem (!%p821_p5), [#allocation2], %s875_s7 }
  0x36   : > { %713 = dma.done.wait (%p817_p4), %s188_s8, 128  }
  0x37   : > { %715 = vsyncadd (%p817_p4), %s188_s8, 4294967168 }
  0x38   : > { %717 = dma.done.wait (%p809_p1), [#allocation6], 1024  }
  0x39   : > { %719 = vsyncadd (%p809_p1), [#allocation6], 4294966272  ;;  %v752_v0 = vmov 0.0   ;;  %vm753_vm0 = vmmov 0   ;;  %v593_v1 = vld [vmem:[#allocation5 + $0x38] sm:$0xff]   ;;  %v594_v2 = vld [vmem:[#allocation5 + $0x30] sm:$0xff]  }
  0x3a   : > { %494 = vmatprep.subr.bf16.mxu0 %v752_v0  ;;  %510 = vmatprep.mubr.msk.bf16.mxu0 %vm753_vm0, %v752_v0  ;;  %v595_v3 = vld [vmem:[#allocation5 + $0x28] sm:$0xff]   ;;  %v596_v4 = vld [vmem:[#allocation5 + $0x20] sm:$0xff]   ;;  %v597_v5 = vld [vmem:[#allocation5 + $0x18] sm:$0xff]   ;;  %p478_p1 = scmp.ne.s32.totalorder %s738_s15, 0 }
  0x3b   : > { %495 = vmatpush3.bf16.msra.mxu0 %v593_v1  ;;  %v598_v6 = vld [vmem:[#allocation5 + $0x10] sm:$0xff]   ;;  %v599_v7 = vld [vmem:[#allocation5 + $0x8] sm:$0xff]   ;;  %v600_v8 = vld [vmem:[#allocation5] sm:$0xff]  }
  0x3c   : > { %496 = vmatprep.subr.bf16.mxu0 %v752_v0  ;;  %v601_v9 = vld [vmem:[%s191_s10] sm:$0xff]  }
  0x3d   : > { %v468_v10 = vld [vmem:[%s930_s2] ss:$0 sm:$0xff] }
  0x3f   : > { %497 = vmatpush3.bf16.msra.mxu0 %v594_v2 }
  0x40   : > { %498 = vmatprep.subr.bf16.mxu0 %v752_v0 }
  0x43   : > { %499 = vmatpush3.bf16.msra.mxu0 %v595_v3 }
  0x44   : > { %500 = vmatprep.subr.bf16.mxu0 %v752_v0 }
  0x47   : > { %501 = vmatpush3.bf16.msra.mxu0 %v596_v4 }
  0x48   : > { %502 = vmatprep.subr.bf16.mxu0 %v752_v0 }
  0x4b   : > { %503 = vmatpush3.bf16.msra.mxu0 %v597_v5 }
  0x4c   : > { %504 = vmatprep.subr.bf16.mxu0 %v752_v0 }
  0x4f   : > { %505 = vmatpush3.bf16.msra.mxu0 %v598_v6 }
  0x50   : > { %506 = vmatprep.subr.bf16.mxu0 %v752_v0 }
  0x53   : > { %507 = vmatpush3.bf16.msra.mxu0 %v599_v7 }
  0x54   : > { %508 = vmatprep.subr.bf16.mxu0 %v752_v0 }
  0x57   : > { %509 = vmatpush3.bf16.msra.mxu0 %v600_v8 }
  0x5a   : > { %511 = vmatmul.mubr.bf16.vlgmr.msra.gmra.mxu0 %v601_v9 }
 0x11a   : > { %v329_v11 = vpop.f32.mrf.mxu0 }
 0x11b   : > { %v330_v12 = vadd.f32 %v468_v10, %v329_v11 }
 0x11c   : > { %v512_v13 = vpop.f32.mrf.mxu0 }
 0x11d   : > { %336 = vmax.xlane.f32.xlu0 %v330_v12 }
 0x11e   : > { %v332_v14 = vpop.f32.mrf.mxu0 }
 0x11f   : > { %v333_v15 = vadd.f32 %v468_v10, %v332_v14 }
 0x120   : > { %v513_v16 = vpop.f32.mrf.mxu0 }
 0x121   : > { %338 = vmax.xlane.f32.xlu0 %v333_v15 }
 0x1a6   : > { %v337_v17 = vpop.xlane.xlu0 %336 }
 0x1a7   : > { %v340_v18 = vsub.f32 %v330_v12, %v337_v17 }
 0x1a9   : > { %v342_v19 = vmul.f32 1.442695, %v340_v18 }
 0x1aa   : > { %v339_v20 = vpop.xlane.xlu0 %338 }
 0x1ab   : > { %602 = vpow2.f32 %v342_v19  ;;  %v341_v21 = vsub.f32 %v333_v15, %v339_v20 }
 0x1ad   : > { %v344_v22 = vmul.f32 1.442695, %v341_v21 }
 0x1af   : > { %604 = vpow2.f32 %v344_v22 }
 0x1b8   : > { %v603_v23 = vpop.eup %602 }
 0x1b9   : > { %346 = vadd.xlane.f32.xlu1 %v603_v23 }
 0x1bc   : > { %v605_v24 = vpop.eup %604 }
 0x1bd   : > { %348 = vadd.xlane.f32.xlu1 %v605_v24 }
 0x242   : > { %v347_v25 = vpop.xlane.xlu1 %346 }
 0x243   : > { %606 = vrcp.f32 %v347_v25 }
 0x246   : > { %v349_v26 = vpop.xlane.xlu1 %348 }
 0x247   : > { %608 = vrcp.f32 %v349_v26 }
 0x250   : > { %v607_v27 = vpop.eup %606 }
 0x251   : > { %v352_v28 = vmul.f32 0.33333334, %v607_v27 }
 0x253   : > { %v354_v29 = vmul.f32 %v603_v23, %v352_v28  ;;  %359 = sbr.rel (%p478_p1) target bundleno = 602 (0x25a), region = 44 }
 0x254   : > { %v609_v30 = vpop.eup %608 }
 0x255   : > { %v353_v31 = vmul.f32 0.33333334, %v609_v30 }
 0x257   : > { %v355_v32 = vmul.f32 %v605_v24, %v353_v31 }
 0x258   : > { %360 = vst [vmem:[#allocation7] sm:$0xff] %v354_v29 }
 0x259   : > { %361 = vst [vmem:[#allocation7 + $0x8] sm:$0xff] %v355_v32 }
 0x25a PF: > { %p479_p4 = scmp.le.s32.totalorder %s738_s15, 0 }
 0x25c   : > { %365 = sbr.rel (%p479_p4) target bundleno = 613 (0x265), region = 48 }
 0x261   : > { %v366_v33 = vld [vmem:[#allocation7] sm:$0xff]  ;;  %v367_v34 = vld [vmem:[#allocation7 + $0x8] sm:$0xff] }
 0x262   : > { %v368_v35 = vadd.f32 %v366_v33, %v354_v29  ;;  %v369_v36 = vadd.f32 %v367_v34, %v355_v32 }
 0x264   : > { %370 = vst [vmem:[#allocation7] sm:$0xff] %v368_v35  ;;  %371 = vst [vmem:[#allocation7 + $0x8] sm:$0xff] %v369_v36 }
 0x265 PF: > { %p895_p5 = scmp.eq.s32.totalorder %s458_s18, 2  ;;  %s754_s27 = smov [#allocation7]  }
 0x266   : > { %s381_s28 = sshll.u32 %s754_s27, 4  ;;  %s382_s28 = int_to_ptr.vmem [resolvable:$true] %s381_s28 }
 0x267   : > { %s664_s11 = scalar_lea.vmem %s382_s28, 256  ;;  %p671_p12 = scmp.lt.s32.totalorder %s382_s28, %s382_s28 }
 0x268   : > { %p665_p10 = scmp.ne.s32.totalorder %s382_s28, %s664_s11  ;;  %p672_p13 = scmp.lt.s32.totalorder %s664_s11, %s664_s11 }
 0x26a   : > { %p666_p11 = pnand %p665_p10, %p895_p5  ;;  %p673_p0 = por %p672_p13, %p671_p12 }
 0x26c   : > { %p667_p7 = pneg %p666_p11 }
 0x26e   : > { %p674_p2 = pnand %p673_p0, %p667_p7 }
 0x270   : > { %677 = shalt.err (!%p674_p2)
}
 0x271   : > { %s755_s15 = smov 128   ;;  %s756_s18 = smov 8  }
 0x272   : > { %521 = dma.vmem_to_hbm [thread:$0]  (%p895_p5), %s382_s28, 256, %s931_s3, [#allocation4], %s755_s15, %s755_s15, %s756_s18  }
 0x273   : > { %721 = dma.done.wait (%p895_p5), [#allocation4], 256  }
 0x274   : > { %723 = vsyncadd (%p895_p5), [#allocation4], 4294967040 }
 0x275 PF: > { %s18_s17 = sadd.s32 1, %s746_s17   ;;  %s938_s12 = smov %s730_s13 }
 0x276   : > { %p15_p3 = scmp.ge.s32.totalorder %s18_s17, 5   ;;  %s939_s13 = smov %s734_s14 }
 0x277   : > { %s940_s14 = smov %s856_s9  ;;  %s941_s15 = smov %s742_s16 }
 0x278   : > { %s942_s16 = smov %s944_s25  ;;  %17 = sbr.rel (!%p15_p3) target bundleno = 6 (0x6), region = 82 }
 0x27d   :  { %397 = vsyncpa [#allocation3], 1 }
 0x27e   :  { %399 = vsyncpa [#allocation3 + $0x1], 1 }
 0x27f   :  { %400 = vsyncpa [#allocation6], 1 }
 0x280   :  { %401 = vsyncpa [#allocation4], 1 }
 0x281   :  { %403 = vsyncpa [#allocation4 + $0x1], 1 }

</bundles_post_ra>
